<compile_context>
chip_gen: v6e
topology: v6e:2x2x1
jax: 0.10.0
libtpu: 0.0.40
codegen_flags: <defaults>
</compile_context>

<pallas_src>
import functools

import jax
import jax.numpy as jnp
from jax import lax
from jax.experimental import pallas as pl
from jax.experimental.pallas import tpu as pltpu


_LANE = 128
_HALO = 3          # halo rows per side: conv(k3,d1) needs 1, conv(k3,d2) needs 2 more


# ----------------------------------------------------------------------------
# Small helpers (host side)
# ----------------------------------------------------------------------------
def _round_up(x, m):
    return (x + m - 1) // m * m


def _pad128(c):
    return _round_up(max(int(c), _LANE), _LANE)


def _tpu_vmem_bytes():
    try:
        return int(pltpu.get_tpu_info().vmem_capacity_bytes)
    except Exception:
        return 0


def _pick_tile_l():
    vmem = _tpu_vmem_bytes()
    if vmem and vmem <= (64 << 20):      # v7x-class: 64 MiB physical VMEM per core
        return 512
    return 1024                           # v5e / v6e: 128 MiB physical VMEM


def _pick_vmem_limit():
    vmem = _tpu_vmem_bytes()
    if not vmem:
        return 56 << 20                   # conservative default, valid everywhere
    return int(max(min(vmem - (8 << 20), 112 << 20), 32 << 20))


# ----------------------------------------------------------------------------
# In-kernel helpers
# ----------------------------------------------------------------------------
def _pool(x_ref, f, cin):
    """AvgPool1d(f) on a channel-folded window ref: (R, f*cin) -> (R, cin) f32."""
    if f == 1:
        return x_ref[...].astype(jnp.float32)
    acc = x_ref[:, 0:cin].astype(jnp.float32)
    for j in range(1, f):                          # aligned lane slices (cin % 128 == 0)
        acc = acc + x_ref[:, j * cin:(j + 1) * cin].astype(jnp.float32)
    return acc * (1.0 / f)


def _conv_taps(a, w_ref, b_ref, *, cin, offsets, rows):
    """y[i] = bias + sum_k a[offsets[k] + i] @ W_k,   i in [0, rows).

    a:     (>= max(offsets)+rows, cin) value already in the weight dtype.
    w_ref: (K*cin, cout) ref (taps stacked along the contraction dim).
    b_ref: (1, cout) f32 ref.
    """
    if cin <= _LANE and len(offsets) > 1:
        # im2col: one MXU matmul with a K*cin contraction fills the 128/256-wide MXU
        # better than K accumulated matmuls with a narrow contraction.
        cat = jnp.concatenate(
            [lax.slice_in_dim(a, o, o + rows, axis=0) for o in offsets], axis=1)
        return b_ref[...] + jnp.dot(cat, w_ref[...],
                                    preferred_element_type=jnp.float32)
    acc = b_ref[...]
    for k, o in enumerate(offsets):
        acc = acc + jnp.dot(lax.slice_in_dim(a, o, o + rows, axis=0),
                            w_ref[k * cin:(k + 1) * cin, :],
                            preferred_element_type=jnp.float32)
    return acc


def _boundary_mask(rows, tl, lo):
    """Validity of global pooled rows [t*tl - 2, t*tl - 2 + rows): one iota per tile."""
    g = lax.broadcasted_iota(jnp.int32, (rows, 1), 0) + (pl.program_id(1) * tl - 2)
    return jnp.logical_and(g >= 0, g < lo)


# ----------------------------------------------------------------------------
# Fused block kernels (one pallas_call per block; grid = (batch, L-tiles))
# ----------------------------------------------------------------------------
def _dblock_kernel(x_ref, w1, b1, w2, b2, wr, br, o_ref, *, f, cin, cout, tl, lo):
    """DBlock tile: [pool(f) -> ReLU -> conv(k3) -> ReLU -> conv(k3, d2)] + conv1x1(pool).

    x_ref: (tl + 6, f*cin) halo'd window;  o_ref: (tl, cout).
    Window row m corresponds to pooled position t*tl - 3 + m (zero-padded outside [0, lo)).
    """
    wdt = w1.dtype
    h0 = _pool(x_ref, f, cin)                               # (tl+6, cin) f32
    xr = h0[_HALO:_HALO + tl].astype(wdt)                   # residual input, kept narrow
    a1 = jnp.maximum(h0, 0.0).astype(wdt)                   # single cast before taps
    h1 = _conv_taps(a1, w1, b1, cin=cin, offsets=(0, 1, 2), rows=tl + 4)
    valid = _boundary_mask(tl + 4, tl, lo)                  # true sequence edges only
    a2 = jnp.where(valid, jnp.maximum(h1, 0.0), 0.0).astype(wdt)
    out = _conv_taps(a2, w2, b2, cin=cout, offsets=(0, 2, 4), rows=tl)
    out = out + _conv_taps(xr, wr, br, cin=cin, offsets=(0,), rows=tl)
    o_ref[...] = out.astype(o_ref.dtype)


def _cond_dblock_kernel(x_ref, c_ref, ws, bs, wl, bl, we, be, wr, br, o_ref,
                        *, f, cin, lc, cout, tl, lo):
    """CondDBlock tile: end(ReLU, conv k3 d2)(start(x) + conv1x1(cond)) + conv1x1(pool(x))."""
    wdt = ws.dtype
    h0 = _pool(x_ref, f, cin)
    xr = h0[_HALO:_HALO + tl].astype(wdt)
    a1 = jnp.maximum(h0, 0.0).astype(wdt)
    h = _conv_taps(a1, ws, bs, cin=cin, offsets=(0, 1, 2), rows=tl + 4)
    cw = c_ref[...].astype(wdt)                             # (tl+6, lc)
    h = h + _conv_taps(cw, wl, bl, cin=lc, offsets=(1,), rows=tl + 4)
    valid = _boundary_mask(tl + 4, tl, lo)
    a2 = jnp.where(valid, jnp.maximum(h, 0.0), 0.0).astype(wdt)
    out = _conv_taps(a2, we, be, cin=cout, offsets=(0, 2, 4), rows=tl)
    out = out + _conv_taps(xr, wr, br, cin=cin, offsets=(0,), rows=tl)
    o_ref[...] = out.astype(o_ref.dtype)


# ----------------------------------------------------------------------------
# Pallas wrappers
# ----------------------------------------------------------------------------
def _wspec(a):
    return pl.BlockSpec(a.shape, lambda b, t, _n=a.ndim: (0,) * _n)


def _halo_windows(x, tl, nt, lo):
    """(B, lo, C) -> (B, nt, tl + 2*HALO, C) overlapping, zero-padded windows."""
    lo_pad = nt * tl
    xp = jnp.pad(x, ((0, 0), (_HALO, _HALO + lo_pad - lo), (0, 0)))
    wins = [lax.slice_in_dim(xp, t * tl, t * tl + tl + 2 * _HALO, axis=1)
            for t in range(nt)]
    return jnp.stack(wins, axis=1)


def _tile_sizes(lo, tile_l):
    tl = min(int(tile_l), _round_up(lo, 8))
    nt = -(-lo // tl)
    return tl, nt


def _fold_pool_input(x, f):
    B, L, C = x.shape
    lo = L // f
    if lo * f != L:                       # PyTorch AvgPool truncation
        x = x[:, :lo * f]
    xf = x.reshape(B, lo, f * C) if f > 1 else x   # free view: rows -> lane groups
    return xf, lo


def dblock_pallas(p, x_blc, tile_l, vmem_limit):
    B = x_blc.shape[0]
    f, cin, cout = p["f"], p["cin"], p["cout"]
    xf, lo = _fold_pool_input(x_blc, f)
    tl, nt = _tile_sizes(lo, tile_l)
    xw = _halo_windows(xf, tl, nt, lo)
    w1, b1 = p["conv1"]["w"], p["conv1"]["b"]
    w2, b2 = p["conv2"]["w"], p["conv2"]["b"]
    wr, br = p["res"]["w"], p["res"]["b"]
    y = pl.pallas_call(
        functools.partial(_dblock_kernel, f=f, cin=cin, cout=cout, tl=tl, lo=lo),
        grid=(B, nt),
        in_specs=[pl.BlockSpec((None, None, tl + 2 * _HALO, f * cin),
                               lambda b, t: (b, t, 0, 0)),
                  _wspec(w1), _wspec(b1), _wspec(w2), _wspec(b2),
                  _wspec(wr), _wspec(br)],
        out_specs=pl.BlockSpec((None, tl, cout), lambda b, t: (b, t, 0)),
        out_shape=jax.ShapeDtypeStruct((B, nt * tl, cout), x_blc.dtype),
        compiler_params=pltpu.CompilerParams(
            dimension_semantics=("parallel", "parallel"),
            vmem_limit_bytes=int(vmem_limit)),
    )(xw, w1, b1, w2, b2, wr, br)
    return y[:, :lo] if nt * tl != lo else y


def cond_dblock_pallas(p, x_blc, c_blc, tile_l, vmem_limit):
    B = x_blc.shape[0]
    f, cin, lc, cout = p["f"], p["cin"], p["lc"], p["cout"]
    xf, lo = _fold_pool_input(x_blc, f)
    assert c_blc.shape[1] == lo and c_blc.shape[2] == lc, (c_blc.shape, lo, lc)
    tl, nt = _tile_sizes(lo, tile_l)
    xw = _halo_windows(xf, tl, nt, lo)
    cw = _halo_windows(c_blc, tl, nt, lo)
    ws, bs = p["start"]["w"], p["start"]["b"]
    wl, bl = p["lc_conv"]["w"], p["lc_conv"]["b"]
    we, be = p["end"]["w"], p["end"]["b"]
    wr, br = p["res"]["w"], p["res"]["b"]
    y = pl.pallas_call(
        functools.partial(_cond_dblock_kernel, f=f, cin=cin, lc=lc, cout=cout,
                          tl=tl, lo=lo),
        grid=(B, nt),
        in_specs=[pl.BlockSpec((None, None, tl + 2 * _HALO, f * cin),
                               lambda b, t: (b, t, 0, 0)),
                  pl.BlockSpec((None, None, tl + 2 * _HALO, lc),
                               lambda b, t: (b, t, 0, 0)),
                  _wspec(ws), _wspec(bs), _wspec(wl), _wspec(bl),
                  _wspec(we), _wspec(be), _wspec(wr), _wspec(br)],
        out_specs=pl.BlockSpec((None, tl, cout), lambda b, t: (b, t, 0)),
        out_shape=jax.ShapeDtypeStruct((B, nt * tl, cout), x_blc.dtype),
        compiler_params=pltpu.CompilerParams(
            dimension_semantics=("parallel", "parallel"),
            vmem_limit_bytes=int(vmem_limit)),
    )(xw, cw, ws, bs, wl, bl, we, be, wr, br)
    return y[:, :lo] if nt * tl != lo else y


# ----------------------------------------------------------------------------
# Parameter init (deterministic, synthetic; PyTorch layout for the reference)
# ----------------------------------------------------------------------------
def init_conv(key, cin, cout, k):
    kw, kb = jax.random.split(key)
    scale = 1.0 / float(cin * k) ** 0.5
    w = jax.random.uniform(kw, (cout, cin, k), jnp.float32, -scale, scale)
    b = jax.random.uniform(kb, (cout,), jnp.float32, -scale, scale)
    return {"w": w, "b": b}


def init_dblock(key, cin, cout, f):
    k1, k2, k3 = jax.random.split(key, 3)
    return {"f": f,
            "conv1": init_conv(k1, cin, cout, 3),
            "conv2": init_conv(k2, cout, cout, 3),
            "res": init_conv(k3, cin, cout, 1)}


def init_cond_dblock(key, cin, lc, f):
    k1, k2, k3, k4 = jax.random.split(key, 4)
    return {"f": f,
            "start": init_conv(k1, cin, 2 * cin, 3),
            "lc": init_conv(k2, lc, 2 * cin, 1),
            "end": init_conv(k3, 2 * cin, 2 * cin, 3),
            "res": init_conv(k4, cin, 2 * cin, 1)}


def init_conditional_dblocks(key, in_channels, lc_channels,
                             factors=(2, 2, 2), out_channels=(128, 256)):
    assert len(factors) == len(out_channels) + 1
    keys = jax.random.split(key, len(out_channels) + 4)
    dblocks = [init_dblock(keys[0], in_channels, 64, 1)]
    cin = 64
    for i, ch in enumerate(out_channels):
        dblocks.append(init_dblock(keys[1 + i], cin, ch, factors[i]))
        cin = ch
    cond = init_cond_dblock(keys[len(out_channels) + 1], cin, lc_channels, factors[-1])
    post = [init_dblock(keys[len(out_channels) + 2], cin * 2, cin * 2, 1),
            init_dblock(keys[len(out_channels) + 3], cin * 2, cin * 2, 1)]
    return {"in_channels": in_channels, "dblocks": dblocks, "cond": cond, "post": post}


# ----------------------------------------------------------------------------
# One-time parameter preprocessing for the kernels (hoisted out of the forward)
# ----------------------------------------------------------------------------
def _prep_conv(cp, cin_store, cout_store, dtype):
    w, b = cp["w"], cp["b"]                           # PyTorch layout: (Cout, Cin, K)
    cout, cin, k = w.shape
    wt = jnp.transpose(w, (2, 1, 0))                  # (K, Cin, Cout)
    wt = jnp.pad(wt, ((0, 0), (0, cin_store - cin), (0, cout_store - cout)))
    return {"w": wt.reshape(k * cin_store, cout_store).astype(dtype),
            "b": jnp.pad(b, (0, cout_store - cout)).reshape(1, -1).astype(jnp.float32)}


def _prep_dblock(p, cin_store, dtype):
    cout = p["conv1"]["w"].shape[0]
    cout_store = _pad128(cout)
    return {"f": int(p["f"]), "cin": int(cin_store), "cout": int(cout_store),
            "conv1": _prep_conv(p["conv1"], cin_store, cout_store, dtype),
            "conv2": _prep_conv(p["conv2"], cout_store, cout_store, dtype),
            "res": _prep_conv(p["res"], cin_store, cout_store, dtype)}


def _prep_cond(p, cin_store, dtype):
    cout = p["start"]["w"].shape[0]
    lc = p["lc"]["w"].shape[1]
    cout_store = _pad128(cout)
    return {"f": int(p["f"]), "cin": int(cin_store), "lc": int(lc),
            "cout": int(cout_store),
            "start": _prep_conv(p["start"], cin_store, cout_store, dtype),
            "lc_conv": _prep_conv(p["lc"], lc, cout_store, dtype),
            "end": _prep_conv(p["end"], cout_store, cout_store, dtype),
            "res": _prep_conv(p["res"], cin_store, cout_store, dtype)}


def prepare_params(params, dtype=jnp.bfloat16, tile_l=None, vmem_limit=None):
    if tile_l is None:
        tile_l = _pick_tile_l()
    if vmem_limit is None:
        vmem_limit = _pick_vmem_limit()
    cin_store = params["in_channels"]     # raw input stays unpadded (tiny, f=1 block)
    dblocks = []
    for p in params["dblocks"]:
        bp = _prep_dblock(p, cin_store, dtype)
        dblocks.append(bp)
        cin_store = bp["cout"]
    cond = _prep_cond(params["cond"], cin_store, dtype)
    cin_store = cond["cout"]
    post = []
    for p in params["post"]:
        bp = _prep_dblock(p, cin_store, dtype)
        post.append(bp)
        cin_store = bp["cout"]
    final_channels = params["post"][-1]["conv1"]["w"].shape[0]
    return {"in_channels": params["in_channels"], "dtype": dtype,
            "tile_l": int(tile_l), "vmem_limit": int(vmem_limit),
            "final_channels": int(final_channels),
            "dblocks": dblocks, "cond": cond, "post": post}


# ----------------------------------------------------------------------------
# Pallas-based forward
# ----------------------------------------------------------------------------
def forward_pallas(kparams, inputs_ncl, conditions_ncl):
    dtype = kparams["dtype"]
    B = inputs_ncl.shape[0]
    x = inputs_ncl.reshape(B, kparams["in_channels"], -1)    # mimics torch .view
    x = jnp.transpose(x, (0, 2, 1)).astype(dtype)            # NCL -> (B, L, C)
    c = jnp.transpose(conditions_ncl, (0, 2, 1)).astype(dtype)
    tl, vl = kparams["tile_l"], kparams["vmem_limit"]
    for p in kparams["dblocks"]:
        x = dblock_pallas(p, x, tl, vl)
    x = cond_dblock_pallas(kparams["cond"], x, c, tl, vl)
    for p in kparams["post"]:
        x = dblock_pallas(p, x, tl, vl)
    x = x[:, :, :kparams["final_channels"]]                   # drop lane padding
    return jnp.transpose(x, (0, 2, 1)).astype(jnp.float32)    # back to NCL


# ----------------------------------------------------------------------------
# Pure-JAX reference (for correctness check)
# ----------------------------------------------------------------------------
def conv1d_ref(x_ncl, cp, dilation=1):
    w, b = cp["w"], cp["b"]
    K = w.shape[-1]
    pad = dilation * (K - 1) // 2
    y = lax.conv_general_dilated(x_ncl, w, window_strides=(1,),
                                 padding=[(pad, pad)], rhs_dilation=(dilation,),
                                 dimension_numbers=("NCH", "OIH", "NCH"))
    return y + b[None, :, None]


def avg_pool_ref(x_ncl, f):
    if f == 1:
        return x_ncl
    B, C, L = x_ncl.shape
    Lout = L // f
    return jnp.mean(x_ncl[:, :, :Lout * f].reshape(B, C, Lout, f), axis=-1)


def dblock_ref(p, x):
    h = avg_pool_ref(x, p["f"])
    h = conv1d_ref(jax.nn.relu(h), p["conv1"], 1)
    h = conv1d_ref(jax.nn.relu(h), p["conv2"], 2)
    res = avg_pool_ref(conv1d_ref(x, p["res"], 1), p["f"])
    return h + res


def cond_dblock_ref(p, x, c):
    h = avg_pool_ref(x, p["f"])
    h = conv1d_ref(jax.nn.relu(h), p["start"], 1) + conv1d_ref(c, p["lc"], 1)
    h = conv1d_ref(jax.nn.relu(h), p["end"], 2)
    res = avg_pool_ref(conv1d_ref(x, p["res"], 1), p["f"])
    return h + res


def forward_ref(params, inputs, conditions):
    B = inputs.shape[0]
    x = inputs.reshape(B, params["in_channels"], -1)
    for p in params["dblocks"]:
        x = dblock_ref(p, x)
    x = cond_dblock_ref(params["cond"], x, conditions)
    for p in params["post"]:
        x = dblock_ref(p, x)
    return x


# ----------------------------------------------------------------------------
if __name__ == "__main__":
    key = jax.random.PRNGKey(0)
    k_param, k_x, k_c = jax.random.split(key, 3)

    B, in_ch, lc_ch, T = 2, 2, 8, 64
    factors = (2, 2, 2)
    out_channels = (16, 32)                  # small stand-ins for default (128, 256)
    T_cond = T // (factors[0] * factors[1] * factors[2])   # = 8

    params = init_conditional_dblocks(k_param, in_ch, lc_ch, factors, out_channels)
    inputs = jax.random.normal(k_x, (B, in_ch, T), jnp.float32)           # NCL
    conditions = jax.random.normal(k_c, (B, lc_ch, T_cond), jnp.float32)  # NCL

    ref = forward_ref(params, inputs, conditions)
    assert ref.shape == (B, 2 * out_channels[-1], T_cond), ref.shape

    # 1) Strict correctness check of the fused, L-tiled kernels in f32.
    kp32 = prepare_params(params, jnp.float32)
    out32 = jax.block_until_ready(forward_pallas(kp32, inputs, conditions))
    assert out32.shape == ref.shape, out32.shape
    err32 = float(jnp.max(jnp.abs(out32 - ref)))
    assert err32 < 1e-3, f"f32 max abs err {err32}"

    # 2) Performance configuration: bf16 operands / activations, f32 accumulation.
    kp_bf16 = prepare_params(params, jnp.bfloat16)
    out_bf = jax.block_until_ready(forward_pallas(kp_bf16, inputs, conditions))
    assert out_bf.shape == ref.shape, out_bf.shape
    scale = float(jnp.max(jnp.abs(ref)))
    err_bf = float(jnp.max(jnp.abs(out_bf - ref)))
    assert err_bf < 0.1 * max(1.0, scale), f"bf16 max abs err {err_bf} (scale {scale})"

    print("KERNEL_OK")
</pallas_src>

<mosaic_0001>
module attributes {stable_mosaic.version = 11 : i64} {
  func.func @_dblock_kernel(%arg0: i32, %arg1: i32, %arg2: memref<1x1x70x2xf32, #tpu.memory_space<vmem>>, %arg3: memref<6x128xf32, #tpu.memory_space<vmem>>, %arg4: memref<1x128xf32, #tpu.memory_space<vmem>>, %arg5: memref<384x128xf32, #tpu.memory_space<vmem>>, %arg6: memref<1x128xf32, #tpu.memory_space<vmem>>, %arg7: memref<2x128xf32, #tpu.memory_space<vmem>>, %arg8: memref<1x128xf32, #tpu.memory_space<vmem>>, %arg9: memref<1x64x128xf32, #tpu.memory_space<vmem>>) attributes {dimension_semantics = [#tpu.dimension_semantics<parallel>, #tpu.dimension_semantics<parallel>], iteration_bounds = array<i64: 2, 1>, scalar_prefetch = 0 : i64, scratch_operands = 0 : i64, tpu.core_type = #tpu.core_type<tc>, window_params = [{transform_indices = @transform_0, window_bounds = array<i64: 1, 1, 70, 2>}, {pipeline_mode = #tpu.pipeline_mode<synchronous>, transform_indices = @transform_1, window_bounds = array<i64: 6, 128>}, {pipeline_mode = #tpu.pipeline_mode<synchronous>, transform_indices = @transform_2, window_bounds = array<i64: 1, 128>}, {pipeline_mode = #tpu.pipeline_mode<synchronous>, transform_indices = @transform_3, window_bounds = array<i64: 384, 128>}, {pipeline_mode = #tpu.pipeline_mode<synchronous>, transform_indices = @transform_4, window_bounds = array<i64: 1, 128>}, {pipeline_mode = #tpu.pipeline_mode<synchronous>, transform_indices = @transform_5, window_bounds = array<i64: 2, 128>}, {pipeline_mode = #tpu.pipeline_mode<synchronous>, transform_indices = @transform_6, window_bounds = array<i64: 1, 128>}, {transform_indices = @transform_7, window_bounds = array<i64: 1, 64, 128>}]} {
    %c0 = arith.constant 0 : index
    %c0_0 = arith.constant 0 : index
    %c0_1 = arith.constant 0 : index
    %c0_2 = arith.constant 0 : index
    %0 = vector.load %arg2[%c0, %c0_0, %c0_1, %c0_2] : memref<1x1x70x2xf32, #tpu.memory_space<vmem>>, vector<1x1x70x2xf32>
    %1 = vector.shape_cast %0 : vector<1x1x70x2xf32> to vector<70x2xf32>
    %2 = vector.extract_strided_slice %1 {offsets = [3, 0], sizes = [64, 2], strides = [1, 1]} : vector<70x2xf32> to vector<64x2xf32>
    %cst = arith.constant 0.000000e+00 : f32
    %3 = vector.broadcast %cst : f32 to vector<70x2xf32>
    %4 = arith.maximumf %1, %3 : vector<70x2xf32>
    %5 = vector.extract_strided_slice %4 {offsets = [0, 0], sizes = [68, 2], strides = [1, 1]} : vector<70x2xf32> to vector<68x2xf32>
    %6 = vector.extract_strided_slice %4 {offsets = [1, 0], sizes = [68, 2], strides = [1, 1]} : vector<70x2xf32> to vector<68x2xf32>
    %7 = vector.extract_strided_slice %4 {offsets = [2, 0], sizes = [68, 2], strides = [1, 1]} : vector<70x2xf32> to vector<68x2xf32>
    %8 = tpu.concatenate %5, %6, %7 in 1 : vector<68x2xf32>, vector<68x2xf32>, vector<68x2xf32> -> vector<68x6xf32>
    %c0_3 = arith.constant 0 : index
    %c0_4 = arith.constant 0 : index
    %9 = vector.load %arg4[%c0_3, %c0_4] : memref<1x128xf32, #tpu.memory_space<vmem>>, vector<1x128xf32>
    %c0_5 = arith.constant 0 : index
    %c0_6 = arith.constant 0 : index
    %10 = vector.load %arg3[%c0_5, %c0_6] : memref<6x128xf32, #tpu.memory_space<vmem>>, vector<6x128xf32>
    %cst_7 = arith.constant dense<0.000000e+00> : vector<68x128xf32>
    %11 = tpu.matmul %8, %10, %cst_7 {dimension_numbers = #tpu.dot_dimension_numbers<[1], [0], [0], [1], [0, 0, 1, 1], [], []>} : vector<68x6xf32>, vector<6x128xf32>, vector<68x128xf32> -> vector<68x128xf32>
    %12 = vector.broadcast %9 : vector<1x128xf32> to vector<68x128xf32>
    %13 = arith.addf %12, %11 : vector<68x128xf32>
    %14 = tpu.iota {dimensions = array<i32: 0>} : vector<68x1xi32>
    %c64_i32 = arith.constant 64 : i32
    %15 = arith.muli %arg1, %c64_i32 : i32
    %c2_i32 = arith.constant 2 : i32
    %16 = arith.subi %15, %c2_i32 : i32
    %17 = vector.broadcast %16 : i32 to vector<68x1xi32>
    %18 = arith.addi %14, %17 : vector<68x1xi32>
    %c0_i32 = arith.constant 0 : i32
    %19 = vector.broadcast %c0_i32 : i32 to vector<68x1xi32>
    %20 = arith.cmpi sge, %18, %19 : vector<68x1xi32>
    %c64_i32_8 = arith.constant 64 : i32
    %21 = vector.broadcast %c64_i32_8 : i32 to vector<68x1xi32>
    %22 = arith.cmpi slt, %18, %21 : vector<68x1xi32>
    %23 = arith.andi %20, %22 : vector<68x1xi1>
    %cst_9 = arith.constant 0.000000e+00 : f32
    %24 = vector.broadcast %cst_9 : f32 to vector<68x128xf32>
    %25 = arith.maximumf %13, %24 : vector<68x128xf32>
    %cst_10 = arith.constant 0.000000e+00 : f32
    %26 = vector.shape_cast %23 : vector<68x1xi1> to vector<68x1xi1>
    %27 = vector.broadcast %26 : vector<68x1xi1> to vector<68x128xi1>
    %28 = vector.broadcast %cst_10 : f32 to vector<68x128xf32>
    %29 = arith.select %27, %25, %28 : vector<68x128xi1>, vector<68x128xf32>
    %30 = vector.extract_strided_slice %29 {offsets = [0, 0], sizes = [64, 128], strides = [1, 1]} : vector<68x128xf32> to vector<64x128xf32>
    %31 = vector.extract_strided_slice %29 {offsets = [2, 0], sizes = [64, 128], strides = [1, 1]} : vector<68x128xf32> to vector<64x128xf32>
    %32 = vector.extract_strided_slice %29 {offsets = [4, 0], sizes = [64, 128], strides = [1, 1]} : vector<68x128xf32> to vector<64x128xf32>
    %33 = tpu.concatenate %30, %31, %32 in 1 : vector<64x128xf32>, vector<64x128xf32>, vector<64x128xf32> -> vector<64x384xf32>
    %c0_11 = arith.constant 0 : index
    %c0_12 = arith.constant 0 : index
    %34 = vector.load %arg6[%c0_11, %c0_12] : memref<1x128xf32, #tpu.memory_space<vmem>>, vector<1x128xf32>
    %c0_13 = arith.constant 0 : index
    %c0_14 = arith.constant 0 : index
    %35 = vector.load %arg5[%c0_13, %c0_14] : memref<384x128xf32, #tpu.memory_space<vmem>>, vector<384x128xf32>
    %cst_15 = arith.constant dense<0.000000e+00> : vector<64x128xf32>
    %36 = tpu.matmul %33, %35, %cst_15 {dimension_numbers = #tpu.dot_dimension_numbers<[1], [0], [0], [1], [0, 0, 1, 1], [], []>} : vector<64x384xf32>, vector<384x128xf32>, vector<64x128xf32> -> vector<64x128xf32>
    %37 = vector.broadcast %34 : vector<1x128xf32> to vector<64x128xf32>
    %38 = arith.addf %37, %36 : vector<64x128xf32>
    %c0_16 = arith.constant 0 : index
    %c0_17 = arith.constant 0 : index
    %39 = vector.load %arg8[%c0_16, %c0_17] : memref<1x128xf32, #tpu.memory_space<vmem>>, vector<1x128xf32>
    %40 = vector.extract_strided_slice %2 {offsets = [0, 0], sizes = [64, 2], strides = [1, 1]} : vector<64x2xf32> to vector<64x2xf32>
    %c0_18 = arith.constant 0 : index
    %c0_19 = arith.constant 0 : index
    %41 = vector.load %arg7[%c0_18, %c0_19] : memref<2x128xf32, #tpu.memory_space<vmem>>, vector<2x128xf32>
    %cst_20 = arith.constant dense<0.000000e+00> : vector<64x128xf32>
    %42 = tpu.matmul %40, %41, %cst_20 {dimension_numbers = #tpu.dot_dimension_numbers<[1], [0], [0], [1], [0, 0, 1, 1], [], []>} : vector<64x2xf32>, vector<2x128xf32>, vector<64x128xf32> -> vector<64x128xf32>
    %43 = vector.broadcast %39 : vector<1x128xf32> to vector<64x128xf32>
    %44 = arith.addf %43, %42 : vector<64x128xf32>
    %45 = arith.addf %38, %44 : vector<64x128xf32>
    %c0_21 = arith.constant 0 : index
    %c0_22 = arith.constant 0 : index
    %c0_23 = arith.constant 0 : index
    %46 = vector.load %arg9[%c0_21, %c0_22, %c0_23] : memref<1x64x128xf32, #tpu.memory_space<vmem>>, vector<1x64x128xf32>
    %47 = vector.shape_cast %46 : vector<1x64x128xf32> to vector<64x128xf32>
    %48 = vector.shape_cast %45 : vector<64x128xf32> to vector<1x64x128xf32>
    tpu.vector_store %arg9[%c0_21, %c0_22, %c0_23], %48 {strides = array<i32>} : memref<1x64x128xf32, #tpu.memory_space<vmem>>, vector<1x64x128xf32>,
    return
  }
  func.func @transform_0(%arg0: i32, %arg1: i32) -> (i32, i32, i32, i32) {
    %c0_i32 = arith.constant 0 : i32
    %c0_i32_0 = arith.constant 0 : i32
    %c0_i32_1 = arith.constant 0 : i32
    return %arg0, %arg1, %c0_i32, %c0_i32_0 : i32, i32, i32, i32
  }
  func.func @transform_1(%arg0: i32, %arg1: i32) -> (i32, i32) {
    %c0_i32 = arith.constant 0 : i32
    %c0_i32_0 = arith.constant 0 : i32
    %c0_i32_1 = arith.constant 0 : i32
    return %c0_i32, %c0_i32_0 : i32, i32
  }
  func.func @transform_2(%arg0: i32, %arg1: i32) -> (i32, i32) {
    %c0_i32 = arith.constant 0 : i32
    %c0_i32_0 = arith.constant 0 : i32
    %c0_i32_1 = arith.constant 0 : i32
    return %c0_i32, %c0_i32_0 : i32, i32
  }
  func.func @transform_3(%arg0: i32, %arg1: i32) -> (i32, i32) {
    %c0_i32 = arith.constant 0 : i32
    %c0_i32_0 = arith.constant 0 : i32
    %c0_i32_1 = arith.constant 0 : i32
    return %c0_i32, %c0_i32_0 : i32, i32
  }
  func.func @transform_4(%arg0: i32, %arg1: i32) -> (i32, i32) {
    %c0_i32 = arith.constant 0 : i32
    %c0_i32_0 = arith.constant 0 : i32
    %c0_i32_1 = arith.constant 0 : i32
    return %c0_i32, %c0_i32_0 : i32, i32
  }
  func.func @transform_5(%arg0: i32, %arg1: i32) -> (i32, i32) {
    %c0_i32 = arith.constant 0 : i32
    %c0_i32_0 = arith.constant 0 : i32
    %c0_i32_1 = arith.constant 0 : i32
    return %c0_i32, %c0_i32_0 : i32, i32
  }
  func.func @transform_6(%arg0: i32, %arg1: i32) -> (i32, i32) {
    %c0_i32 = arith.constant 0 : i32
    %c0_i32_0 = arith.constant 0 : i32
    %c0_i32_1 = arith.constant 0 : i32
    return %c0_i32, %c0_i32_0 : i32, i32
  }
  func.func @transform_7(%arg0: i32, %arg1: i32) -> (i32, i32, i32) {
    %c0_i32 = arith.constant 0 : i32
    %c0_i32_0 = arith.constant 0 : i32
    return %arg0, %arg1, %c0_i32 : i32, i32, i32
  }
}

</mosaic_0001>

<bundles_post_ra>
// kernel: tpu_custom_call.1
= control target key start
LH: loop header
LB: loop body
LE: loop exit
PB: predicated region body
PF: predicated region fallthrough
CT: control target
= control target key end

     0   :  { %12 = vsyncpa [#allocation3], 0  ;;  %s2174_s0 = inlined_call_operand.vmem [shape: f32[2,1,70,2], index: 0, kind: input, shape index: {}]   ;;  %s2175_s1 = inlined_call_operand.vmem [shape: f32[6,128], index: 1, kind: input, shape index: {}]   ;;  %s2176_s2 = inlined_call_operand.vmem [shape: f32[1,128], index: 2, kind: input, shape index: {}]   ;;  %s2177_s3 = inlined_call_operand.hbm [shape: f32[384,128], index: 3, kind: input, shape index: {}]   ;;  %s2178_s4 = inlined_call_operand.vmem [shape: f32[1,128], index: 4, kind: input, shape index: {}]   ;;  %s2179_s5 = inlined_call_operand.vmem [shape: f32[2,128], index: 5, kind: input, shape index: {}]   ;;  %s2180_s6 = inlined_call_operand.vmem [shape: f32[1,128], index: 6, kind: input, shape index: {}]   ;;  %s2181_s7 = inlined_call_operand.hbm [shape: f32[2,64,128], index: 7, kind: output, shape index: {}]  }
   0x1   :  { %13 = vsyncpa [#allocation4], 0 }
   0x2   :  { %15 = vsyncpa [#allocation4 + $0x1], 0  ;;  %s1787_s24 = smov 0   ;;  %s1789_s25 = smov 0  }
   0x3   :  { %s1791_s26 = smov 0   ;;  %s1793_s27 = smov 0  }
   0x4   :  { %s1795_s28 = smov 0   ;;  %s1797_s29 = smov 0  }
   0x5 LB: > { %s1328_s30 = sadd.s32 4294967295, %s1735_s29   ;;  %s1329_s8 = sadd.s32 4294967294, %s1735_s29   ;;  %s1735_s29 = sphi %s1797_s29, %s21_s29   ;;  %s1731_s28 = sphi %s1795_s28, %s2190_s28   ;;  %s1727_s27 = sphi %s1793_s27, %s2189_s27   ;;  %s1723_s26 = sphi %s1791_s26, %s2188_s26   ;;  %s1719_s25 = sphi %s1789_s25, %s2187_s25   ;;  %s1715_s24 = sphi %s1787_s24, %s2186_s24  }
   0x6   : > { %s33_s9 = sadd.s32 1, %s1731_s28  ;;  %s196_s10 = sadd.s32 1, %s1723_s26 }
   0x7   : > { %p35_p0 = scmp.ge.s32.totalorder %s33_s9, 2  ;;  %p206_p1 = scmp.ne.s32.totalorder %s1723_s26, %s1719_s25 }
   0x8   : > { %p207_p2 = scmp.eq.s32.totalorder %s1328_s30, 1  ;;  %p212_p3 = scmp.ne.s32.totalorder %s1719_s25, %s1715_s24 }
   0x9   : > { %s2192_s9 = smov (%p35_p0, %s33_s9), 0  ;;  %p213_p5 = scmp.eq.s32.totalorder %s1329_s8, 1 }
   0xa   : > { %p1827_p4 = por %p207_p2, %p206_p1  ;;  %s191_s12 = ssub.s32 %s1731_s28, %s2192_s9 }
   0xb   : > { %p1330_p6 = scmp.ge.s32.totalorder %s1735_s29, 1  ;;  %p194_p7 = scmp.eq.s32.totalorder %s191_s12, 0 }
   0xc   : > { %p1834_p8 = por %p213_p5, %p212_p3  ;;  %p220_p9 = scmp.lt.s32.totalorder %s1735_s29, 3 }
   0xd   : > { %s1840_s14 = scalar_select %p194_p7, %s1723_s26, %s196_s10  }
   0xe   : > { %p1842_p10 = pnand %p1330_p6, %p220_p9  ;;  %p1846_p11 = scmp.eq.s32.totalorder %s1328_s30, 0 }
   0xf   : > { %s1737_s17 = smov [#allocation2]  }
  0x10   : > { %p1561_p12 = pneg %p1842_p10  ;;  %s238_s18 = sshll.u32 %s1737_s17, 4  ;;  %s239_s18 = int_to_ptr.vmem [resolvable:$true] %s238_s18 }
  0x11   : > { %s1640_s19 = scalar_lea.vmem %s239_s18, 6144  ;;  %p1648_p5 = scmp.lt.s32.totalorder %s239_s18, %s239_s18 }
  0x12   : > { %p1562_p13 = pnand %p1846_p11, %p1561_p12  ;;  %p1641_p1 = scmp.ne.s32.totalorder %s239_s18, %s1640_s19 }
  0x13   : > { %p1649_p6 = scmp.lt.s32.totalorder %s1640_s19, %s1640_s19 }
  0x14   : > { %p1631_p0 = pneg %p1562_p13 }
  0x15   : > { %p1650_p7 = por %p1649_p6, %p1648_p5 }
  0x16   : > { %p1643_p2 = pnand %p1641_p1, %p1631_p0 }
  0x18   : > { %p1644_p3 = pneg %p1643_p2 }
  0x1a   : > { %p1651_p9 = pnand %p1650_p7, %p1644_p3 }
  0x1c   : > { %1654 = shalt.err (!%p1651_p9)
}
  0x1d   : > { %s1738_s20 = smov 128   ;;  %s1739_s21 = smov 8  }
  0x1e   : > { %1564 = dma.hbm_to_vmem [thread:$0]  (!%p1562_p13), %s2177_s3, 6144, %s239_s18, [#allocation3], %s1738_s20, %s1738_s20, %s1739_s21  }
  0x1f   : > { %275 = sbr.rel (%p1842_p10) target bundleno = 628 (0x274), region = 48 }
  0x24   : > { %1706 = dma.done.wait (%p1846_p11), [#allocation3], 6144  }
  0x25   : > { %1708 = vsyncadd (%p1846_p11), [#allocation3], 4294961152  ;;  %p311_p12 = scmp.lt.s32.totalorder %s1727_s27, 1  ;;  %v1740_v0 = vmov 0.0   ;;  %vm1741_vm0 = vmmov 0   ;;  %vm348_vm1 = vcmask 1046528  }
  0x26   : > { %1465 = vmatprep.subr.mxu0 %v1740_v0  ;;  %1552 = vmatprep.subr.mxu1 %v1740_v0  ;;  %vm393_vm2 = vcmask 1045504   ;;  %v459_v16 = vld [vmem:[%s2175_s1] sm:$0x3f]  ;;  %s1742_s18 = smov 2   ;;  %s1743_s19 = smov 4   ;;  %v793_v48 = vld [vmem:[#allocation2 + $0xf8] sm:$0xff] }
  0x27   : > { %s312_s30 = scalar_select %p311_p12, %s1727_s27, 1  ;;  %1467 = vmatprep.mubr.msk.f32.mxu0 %vm1741_vm0, %v1740_v0  ;;  %1491 = vmatprep.mubr.msk.f32.mxu1 %vm1741_vm0, %v1740_v0  ;;  %v809_v52 = vld [vmem:[#allocation2 + $0x178] sm:$0xff]  ;;  %vm438_vm3 = vcmask 15360   ;;  %vm448_vm4 = vcmask 31744   ;;  %vm460_vm5 = vcmask 48128   ;;  %v808_v62 = vld [vmem:[#allocation2 + $0x170] sm:$0xff] }
  0x28   : > { %1466 = vmatpush3.msk.msra.mxu0 %vm393_vm2, %v459_v16  ;;  %1553 = vmatpush3.msk.msra.mxu1 %vm393_vm2, %v459_v16  ;;  %v807_v63 = vld [vmem:[#allocation2 + $0x168] sm:$0xff]  ;;  %vm1079_vm6 = vcmask 1041408   ;;  %vm735_vm8 = vcmask 1043456   ;;  %vm1045_vm10 = vcmask 1044480  }
  0x29   : > { %s1554_s8 = smul.u32 72, %s312_s30  ;;  %1376 = vmatprep.subr.mxu1 %v793_v48  ;;  %1494 = vmatprep.subr.mxu0 %v809_v52  ;;  %v792_v48 = vld [vmem:[#allocation2 + $0xf0] sm:$0xff]  ;;  %s308_s30 = sand.u32 1, %s1719_s25  }
  0x2a   : > { %s1335_s12 = sshll.u32 %s308_s30, 6 }
  0x2b   : > { %s1874_s15 = scalar_lea.vmem %s2174_s0, %s1554_s8  ;;  %s2108_s17 = scalar_lea.vmem [#allocation5], %s1335_s12 }
  0x2c   : > { %v1877_v1 = vld [vmem:[%s1874_s15 + $0x8] sm:$0xff]  ;;  %v1880_v2 = vld [vmem:[%s1874_s15 + $0x10] sm:$0xff]  ;;  %v1883_v3 = vld [vmem:[%s1874_s15] sm:$0xff]  ;;  %s1744_s8 = smov [#allocation5]  }
  0x2d   : > { %v1886_v4 = vmax.f32 %v1877_v1, 0.0  ;;  %v1889_v5 = vmax.f32 %v1880_v2, 0.0  ;;  %v1892_v6 = vmax.f32 %v1883_v3, 0.0  ;;  %v1895_v7 = vld [vmem:[%s1874_s15 + $0x18] sm:$0xff]  ;;  %v1905_v13 = vld [vmem:[%s1874_s15 + $0x20] sm:$0xff]  ;;  %v1926_v24 = vld [vmem:[%s1874_s15 + $0x28] sm:$0xff] }
  0x2e   : > { %v1898_v8 = vmax.f32 %v1895_v7, 0.0  ;;  %v1919_v19 = vmax.f32 %v1905_v13, 0.0  ;;  %v1935_v29 = vmax.f32 %v1926_v24, 0.0  ;;  %v1938_v30 = vld [vmem:[%s1874_s15 + $0x30] sm:$0xff]  ;;  %v1950_v36 = vld [vmem:[%s1874_s15 + $0x38] sm:$0xff]  ;;  %s1659_s10 = sshll.u32 %s1744_s8, 4  ;;  %s1660_s10 = int_to_ptr.vmem [resolvable:$false] %s1659_s10 }
  0x2f   : > { %v350_v9 = vrot.slane %v1886_v4, 1  ;;  %v352_v10 = vrot.slane %v1889_v5, 1  ;;  %v349_v11 = vrot.slane %v1892_v6, 1  ;;  %v395_v12 = vrot.slane %v1886_v4, 2  ;;  %v1962_v42 = vld [vmem:[%s1874_s15 + $0x40] sm:$0x3f] }
  0x30   : > { %v397_v14 = vrot.slane %v1889_v5, 2  ;;  %v394_v15 = vrot.slane %v1892_v6, 2  ;;  %v399_v22 = vrot.slane %v1898_v8, 2  ;;  %v354_v23 = vrot.slane %v1898_v8, 1  ;;  %s1661_s12 = scalar_lea.vmem %s1660_s10, 2048 }
  0x31   : > { %v353_v17 = vsel %vm348_vm1, %v350_v9, %v352_v10  ;;  %v351_v18 = vsel %vm348_vm1, %v349_v11, %v350_v9  ;;  %v401_v25 = vrot.slane %v1919_v19, 2  ;;  %v356_v28 = vrot.slane %v1919_v19, 1 }
  0x32   : > { %368 = vrot.lane.b32.xlu1 %v353_v17, %s1742_s18  ;;  %366 = vrot.lane.b32.xlu0 %v351_v18, %s1742_s18  ;;  %v398_v20 = vsel %vm393_vm2, %v395_v12, %v397_v14  ;;  %v396_v21 = vsel %vm393_vm2, %v394_v15, %v395_v12  ;;  %v400_v26 = vsel %vm393_vm2, %v397_v14, %v399_v22  ;;  %v403_v33 = vrot.slane %v1935_v29, 2  ;;  %v806_v12 = vld [vmem:[#allocation2 + $0x160] sm:$0xff]  ;;  %v805_v15 = vld [vmem:[#allocation2 + $0x158] sm:$0xff]  ;;  %v804_v18 = vld [vmem:[#allocation2 + $0x150] sm:$0xff] }
  0x33   : > { %v355_v27 = vsel %vm348_vm1, %v352_v10, %v354_v23  ;;  %v402_v31 = vsel %vm393_vm2, %v399_v22, %v401_v25  ;;  %v357_v32 = vsel %vm348_vm1, %v354_v23, %v356_v28  ;;  %v358_v34 = vrot.slane %v1935_v29, 1 }
  0x34   : > { %v1947_v35 = vmax.f32 %v1938_v30, 0.0  ;;  %v1955_v37 = vmax.f32 %v1950_v36, 0.0  ;;  %v404_v38 = vsel %vm393_vm2, %v401_v25, %v403_v33  ;;  %v1967_v43 = vmax.f32 %v1962_v42, 0.0  ;;  %v802_v25 = vld [vmem:[#allocation2 + $0x140] sm:$0xff] }
  0x35   : > { %v359_v39 = vsel %vm348_vm1, %v356_v28, %v358_v34 }
  0x36   : > { %413 = vrot.lane.b32.xlu1 %v398_v20, %s1743_s19  ;;  %411 = vrot.lane.b32.xlu0 %v396_v21, %s1743_s19  ;;  %v405_v40 = vrot.slane %v1947_v35, 2  ;;  %v360_v41 = vrot.slane %v1947_v35, 1  ;;  %v407_v46 = vrot.slane %v1955_v37, 2  ;;  %v362_v47 = vrot.slane %v1955_v37, 1 }
  0x37   : > { %v364_v51 = vrot.slane %v1967_v43, 1  ;;  %v409_v54 = vrot.slane %v1967_v43, 2 }
  0x38   : > { %v406_v44 = vsel %vm393_vm2, %v403_v33, %v405_v40  ;;  %v361_v45 = vsel %vm348_vm1, %v358_v34, %v360_v41  ;;  %v408_v49 = vsel %vm393_vm2, %v405_v40, %v407_v46  ;;  %v363_v50 = vsel %vm348_vm1, %v360_v41, %v362_v47 }
  0x39   : > { %v365_v53 = vsel %vm348_vm1, %v362_v47, %v364_v51  ;;  %v410_v55 = vsel %vm393_vm2, %v407_v46, %v409_v54 }
  0x3a   : > { %415 = vrot.lane.b32.xlu1 %v400_v26, %s1743_s19  ;;  %370 = vrot.lane.b32.xlu0 %v355_v27, %s1742_s18 }
  0x3e   : > { %417 = vrot.lane.b32.xlu1 %v402_v31, %s1743_s19  ;;  %372 = vrot.lane.b32.xlu0 %v357_v32, %s1742_s18 }
  0x42   : > { %419 = vrot.lane.b32.xlu1 %v404_v38, %s1743_s19  ;;  %374 = vrot.lane.b32.xlu0 %v359_v39, %s1742_s18 }
  0x46   : > { %421 = vrot.lane.b32.xlu1 %v406_v44, %s1743_s19  ;;  %376 = vrot.lane.b32.xlu0 %v361_v45, %s1742_s18  ;;  %v777_v45 = vld [vmem:[#allocation2 + $0x78] sm:$0xff] }
  0x4a   : > { %423 = vrot.lane.b32.xlu1 %v408_v49, %s1743_s19  ;;  %378 = vrot.lane.b32.xlu0 %v363_v50, %s1742_s18  ;;  %v776_v49 = vld [vmem:[#allocation2 + $0x70] sm:$0xff]  ;;  %v790_v50 = vld [vmem:[#allocation2 + $0xe0] sm:$0xff] }
  0x4e   : > { %382 = vrot.lane.b32.xlu1 %v364_v51, %s1742_s18  ;;  %380 = vrot.lane.b32.xlu0 %v365_v53, %s1742_s18  ;;  %v789_v51 = vld [vmem:[#allocation2 + $0xd8] sm:$0xff]  ;;  %v788_v53 = vld [vmem:[#allocation2 + $0xd0] sm:$0xff]  ;;  %s1234_s18 = sshll.u32 %s2108_s17, 4  ;;  %s2118_s18 = int_to_ptr.vmem [resolvable:$true] %s1234_s18 }
  0x4f   : > { %s1655_s23 = scalar_lea.vmem %s2118_s18, 1024  ;;  %p1662_p0 = scmp.lt.s32.totalorder %s2118_s18, %s1660_s10 }
  0x50   : > { %p1656_p10 = scmp.ne.s32.totalorder %s2118_s18, %s1655_s23  ;;  %p1663_p1 = scmp.lt.s32.totalorder %s1661_s12, %s1655_s23 }
  0x52   : > { %427 = vrot.lane.b32.xlu1 %v409_v54, %s1743_s19  ;;  %425 = vrot.lane.b32.xlu0 %v410_v55, %s1743_s19  ;;  %v772_v54 = vld [vmem:[#allocation2 + $0x50] sm:$0xff]  ;;  %v787_v55 = vld [vmem:[#allocation2 + $0xc8] sm:$0xff]  ;;  %s1365_s19 = sshll.u32 %s1727_s27, 10  ;;  %s2129_s27 = scalar_lea.sflag [#allocation4], %s308_s30 }
  0x53   : > { %s2123_s22 = scalar_lea.hbm %s2181_s7, %s1365_s19  ;;  %p1657_p11 = pnand %p1656_p10, %p1827_p4 }
  0x54   : > { %p1664_p2 = por %p1663_p1, %p1662_p0 }
  0x55   : > { %p1658_p13 = pneg %p1657_p11 }
  0x57   : > { %p1665_p3 = pnand %p1664_p2, %p1658_p13 }
  0xa4   : > { %v369_v56 = vpop.permute.xlu1 %368  ;;  %v367_v57 = vpop.permute.xlu0 %366 }
  0xa5   : > { %v439_v58 = vsel %vm438_vm3, %v1892_v6, %v367_v57  ;;  %v440_v9 = vsel %vm438_vm3, %v1886_v4, %v369_v56  ;;  %v771_v56 = vld [vmem:[#allocation2 + $0x48] sm:$0xff]  ;;  %v786_v57 = vld [vmem:[#allocation2 + $0xc0] sm:$0xff] }
  0xa8   : > { %v414_v59 = vpop.permute.xlu1 %413  ;;  %v412_v60 = vpop.permute.xlu0 %411 }
  0xa9   : > { %v449_v61 = vsel %vm448_vm4, %v439_v58, %v412_v60  ;;  %v450_v6 = vsel %vm448_vm4, %v440_v9, %v414_v59  ;;  %v770_v58 = vld [vmem:[#allocation2 + $0x40] sm:$0xff]  ;;  %v785_v59 = vld [vmem:[#allocation2 + $0xb8] sm:$0xff]  ;;  %v783_v9 = vld [vmem:[#allocation2 + $0xa8] sm:$0xff] }
  0xaa   : > { %1468 = vmatmul.mubr.msk.f32.vlgmr.msra.gmra.mxu0 %vm460_vm5, %v449_v61  ;;  %v769_v60 = vld [vmem:[#allocation2 + $0x38] sm:$0xff]  ;;  %v784_v61 = vld [vmem:[#allocation2 + $0xb0] sm:$0xff] }
  0xab   : > { %1470 = vmatprep.mubr.msk.f32.mxu0 %vm1741_vm0, %v1740_v0  ;;  %1495 = vmatpush3.msra.mxu0 %v809_v52  ;;  %v773_v52 = vld [vmem:[#allocation2 + $0x58] sm:$0xff] }
  0xac   : > { %v416_v10 = vpop.permute.xlu1 %415  ;;  %v371_v11 = vpop.permute.xlu0 %370  ;;  %1496 = vmatprep.subr.mxu0 %v808_v62 }
  0xad   : > { %1497 = vmatpush3.msra.mxu0 %v808_v62  ;;  %v441_v14 = vsel %vm438_vm3, %v1889_v5, %v371_v11  ;;  %v803_v5 = vld [vmem:[#allocation2 + $0x148] sm:$0xff]  ;;  %v768_v62 = vld [vmem:[#allocation2 + $0x30] sm:$0xff] }
  0xae   : > { %1471 = vmatmul.mubr.msk.f32.gmra.mxu0 %vm460_vm5, %v450_v6  ;;  %1498 = vmatprep.subr.mxu0 %v807_v63  ;;  %v451_v17 = vsel %vm448_vm4, %v441_v14, %v416_v10  ;;  %v767_v10 = vld [vmem:[#allocation2 + $0x28] sm:$0xff]  ;;  %v800_v11 = vld [vmem:[#allocation2 + $0x130] sm:$0xff]  ;;  %v782_v6 = vld [vmem:[#allocation2 + $0xa0] sm:$0xff] }
  0xaf   : > { %1473 = vmatprep.mubr.msk.f32.mxu0 %vm1741_vm0, %v1740_v0  ;;  %1499 = vmatpush3.msra.mxu0 %v807_v63  ;;  %v801_v63 = vld [vmem:[#allocation2 + $0x138] sm:$0xff]  ;;  %v799_v14 = vld [vmem:[#allocation2 + $0x128] sm:$0xff] }
  0xb0   : > { %v418_v16 = vpop.permute.xlu1 %417  ;;  %v373_v4 = vpop.permute.xlu0 %372  ;;  %1500 = vmatprep.subr.mxu0 %v806_v12 }
  0xb1   : > { %1501 = vmatpush3.msra.mxu0 %v806_v12  ;;  %v442_v20 = vsel %vm438_vm3, %v1898_v8, %v373_v4  ;;  %v766_v12 = vld [vmem:[#allocation2 + $0x20] sm:$0xff] }
  0xb2   : > { %1474 = vmatmul.mubr.msk.f32.gmra.mxu0 %vm460_vm5, %v451_v17  ;;  %1502 = vmatprep.subr.mxu0 %v805_v15  ;;  %v452_v23 = vsel %vm448_vm4, %v442_v20, %v418_v16  ;;  %v765_v16 = vld [vmem:[#allocation2 + $0x18] sm:$0xff]  ;;  %v798_v4 = vld [vmem:[#allocation2 + $0x120] sm:$0xff]  ;;  %v780_v17 = vld [vmem:[#allocation2 + $0x90] sm:$0xff] }
  0xb3   : > { %1476 = vmatprep.mubr.msk.f32.mxu0 %vm1741_vm0, %v1740_v0  ;;  %1503 = vmatpush3.msra.mxu0 %v805_v15  ;;  %v781_v15 = vld [vmem:[#allocation2 + $0x98] sm:$0xff] }
  0xb4   : > { %v420_v21 = vpop.permute.xlu1 %419  ;;  %v375_v22 = vpop.permute.xlu0 %374  ;;  %1504 = vmatprep.subr.mxu0 %v804_v18  ;;  %v797_v20 = vld [vmem:[#allocation2 + $0x118] sm:$0xff] }
  0xb5   : > { %1505 = vmatpush3.msra.mxu0 %v804_v18  ;;  %v443_v26 = vsel %vm438_vm3, %v1919_v19, %v375_v22  ;;  %v764_v18 = vld [vmem:[#allocation2 + $0x10] sm:$0xff] }
  0xb6   : > { %1477 = vmatmul.mubr.msk.f32.gmra.mxu0 %vm460_vm5, %v452_v23  ;;  %1506 = vmatprep.subr.mxu0 %v803_v5  ;;  %v453_v28 = vsel %vm448_vm4, %v443_v26, %v420_v21  ;;  %v763_v21 = vld [vmem:[#allocation2 + $0x8] sm:$0xff]  ;;  %v796_v22 = vld [vmem:[#allocation2 + $0x110] sm:$0xff]  ;;  %v778_v23 = vld [vmem:[#allocation2 + $0x80] sm:$0xff] }
  0xb7   : > { %1479 = vmatprep.mubr.msk.f32.mxu0 %vm1741_vm0, %v1740_v0  ;;  %1507 = vmatpush3.msra.mxu0 %v803_v5  ;;  %v779_v5 = vld [vmem:[#allocation2 + $0x88] sm:$0xff] }
  0xb8   : > { %v422_v8 = vpop.permute.xlu1 %421  ;;  %v377_v27 = vpop.permute.xlu0 %376  ;;  %1508 = vmatprep.subr.mxu0 %v802_v25  ;;  %v795_v26 = vld [vmem:[#allocation2 + $0x108] sm:$0xff] }
  0xb9   : > { %1509 = vmatpush3.msra.mxu0 %v802_v25  ;;  %v444_v31 = vsel %vm438_vm3, %v1935_v29, %v377_v27  ;;  %v762_v25 = vld [vmem:[#allocation2] sm:$0xff] }
  0xba   : > { %1480 = vmatmul.mubr.msk.f32.gmra.mxu0 %vm460_vm5, %v453_v28  ;;  %v454_v33 = vsel %vm448_vm4, %v444_v31, %v422_v8  ;;  %1510 = vmatprep.subr.mxu0 %v801_v63  ;;  %v794_v8 = vld [vmem:[#allocation2 + $0x100] sm:$0xff]  ;;  %v616_v28 = vlaneseq }
  0xbb   : > { %1482 = vmatprep.mubr.msk.f32.mxu0 %vm1741_vm0, %v1740_v0  ;;  %1511 = vmatpush3.msra.mxu0 %v801_v63  ;;  %v1035_v27 = vld [vmem:[%s2179_s5] sm:$0x3] }
  0xbc   : > { %v424_v19 = vpop.permute.xlu1 %423  ;;  %v379_v32 = vpop.permute.xlu0 %378  ;;  %1512 = vmatprep.subr.mxu0 %v800_v11  ;;  %v617_v31 = vshrl.u32 %v616_v28, 7 }
  0xbd   : > { %v445_v34 = vsel %vm438_vm3, %v1947_v35, %v379_v32  ;;  %1513 = vmatpush3.msra.mxu0 %v800_v11 }
  0xbe   : > { %1483 = vmatmul.mubr.msk.f32.gmra.mxu0 %vm460_vm5, %v454_v33  ;;  %v455_v29 = vsel %vm448_vm4, %v445_v34, %v424_v19  ;;  %1514 = vmatprep.subr.mxu0 %v799_v14  ;;  %v2044_v19 = vld [vmem:[%s2176_s2] ss:$0 sm:$0xff]  ;;  %v629_v32 = vadd.s32 4294967294, %v617_v31 }
  0xbf   : > { %1485 = vmatprep.mubr.msk.f32.mxu0 %vm1741_vm0, %v1740_v0  ;;  %1515 = vmatpush3.msra.mxu0 %v799_v14 }
  0xc0   : > { %v383_v38 = vpop.permute.xlu1 %382  ;;  %v381_v39 = vpop.permute.xlu0 %380  ;;  %1516 = vmatprep.subr.mxu0 %v798_v4  ;;  %vm638_vm7 = vcmp.ge.s32.totalorder %v629_v32, 0 }
  0xc1   : > { %v447_v40 = vsel %vm438_vm3, %v1967_v43, %v383_v38  ;;  %v446_v35 = vsel %vm438_vm3, %v1955_v37, %v381_v39  ;;  %v775_v43 = vld [vmem:[#allocation2 + $0x68] sm:$0xff]  ;;  %v774_v37 = vld [vmem:[#allocation2 + $0x60] sm:$0xff]  ;;  %1517 = vmatpush3.msra.mxu0 %v798_v4 }
  0xc2   : > { %1486 = vmatmul.mubr.msk.f32.gmra.mxu0 %vm460_vm5, %v455_v29  ;;  %1518 = vmatprep.subr.mxu0 %v797_v20 }
  0xc3   : > { %1488 = vmatprep.mubr.msk.f32.mxu0 %vm1741_vm0, %v1740_v0  ;;  %v791_v0 = vld [vmem:[#allocation2 + $0xe8] sm:$0xff]  ;;  %1519 = vmatpush3.msra.mxu0 %v797_v20 }
  0xc4   : > { %v428_v41 = vpop.permute.xlu1 %427  ;;  %v426_v44 = vpop.permute.xlu0 %425  ;;  %1520 = vmatprep.subr.mxu0 %v796_v22 }
  0xc5   : > { %v457_v46 = vsel %vm448_vm4, %v447_v40, %v428_v41  ;;  %v456_v47 = vsel %vm448_vm4, %v446_v35, %v426_v44  ;;  %1521 = vmatpush3.msra.mxu0 %v796_v22 }
  0xc6   : > { %1489 = vmatmul.mubr.msk.f32.gmra.mxu0 %vm460_vm5, %v456_v47  ;;  %1492 = vmatmul.mubr.msk.f32.vlgmr.msra.gmra.mxu1 %vm460_vm5, %v457_v46 }
  0xc7   : > { %1377 = vmatpush3.msra.mxu1 %v777_v45  ;;  %1522 = vmatprep.subr.mxu0 %v795_v26 }
  0xc8   : > { %1378 = vmatprep.subr.mxu1 %v792_v48  ;;  %1523 = vmatpush3.msra.mxu0 %v795_v26 }
  0xc9   : > { %1379 = vmatpush3.msra.mxu1 %v776_v49  ;;  %1524 = vmatprep.subr.mxu0 %v794_v8 }
  0xca   : > { %1380 = vmatprep.subr.mxu1 %v791_v0  ;;  %1525 = vmatpush3.msra.mxu0 %v794_v8 }
  0xcb   : > { %1381 = vmatpush3.msra.mxu1 %v775_v43  ;;  %1538 = vmatprep.subr.msk.mxu0 %vm1079_vm6, %v1035_v27 }
  0xcc   : > { %1382 = vmatprep.subr.mxu1 %v790_v50 }
  0xcd   : > { %1383 = vmatpush3.msra.mxu1 %v774_v37 }
  0xce   : > { %1384 = vmatprep.subr.mxu1 %v789_v51 }
  0xcf   : > { %1385 = vmatpush3.msra.mxu1 %v773_v52 }
  0xd0   : > { %1386 = vmatprep.subr.mxu1 %v788_v53 }
  0xd1   : > { %1387 = vmatpush3.msra.mxu1 %v772_v54 }
  0xd2   : > { %1388 = vmatprep.subr.mxu1 %v787_v55 }
  0xd3   : > { %1389 = vmatpush3.msra.mxu1 %v771_v56 }
  0xd4   : > { %1390 = vmatprep.subr.mxu1 %v786_v57 }
  0xd5   : > { %1391 = vmatpush3.msra.mxu1 %v770_v58 }
  0xd6   : > { %1392 = vmatprep.subr.mxu1 %v785_v59 }
  0xd7   : > { %1393 = vmatpush3.msra.mxu1 %v769_v60 }
  0xd8   : > { %1394 = vmatprep.subr.mxu1 %v784_v61 }
  0xd9   : > { %1395 = vmatpush3.msra.mxu1 %v768_v62 }
  0xda   : > { %1396 = vmatprep.subr.mxu1 %v783_v9 }
  0xdb   : > { %1397 = vmatpush3.msra.mxu1 %v767_v10 }
  0xdc   : > { %1398 = vmatprep.subr.mxu1 %v782_v6 }
  0xdd   : > { %1399 = vmatpush3.msra.mxu1 %v766_v12 }
  0xde   : > { %1400 = vmatprep.subr.mxu1 %v781_v15 }
  0xdf   : > { %1401 = vmatpush3.msra.mxu1 %v765_v16 }
  0xe0   : > { %1402 = vmatprep.subr.mxu1 %v780_v17  ;;  %v625_v17 = vadd.s32 64, %v617_v31 }
  0xe1   : > { %1403 = vmatpush3.msra.mxu1 %v764_v18 }
  0xe2   : > { %1404 = vmatprep.subr.mxu1 %v779_v5  ;;  %v637_v8 = vadd.s32 4294967294, %v625_v17 }
  0xe3   : > { %1405 = vmatpush3.msra.mxu1 %v763_v21 }
  0xe4   : > { %1406 = vmatprep.subr.mxu1 %v778_v23  ;;  %vm655_vm9 = vcmp.lt.s32.totalorder %v637_v8, 64 }
  0xe5   : > { %1407 = vmatpush3.msra.mxu1 %v762_v25 }
 0x16a   : > { %v557_v33 = vpop.f32.mrf.mxu0 }
 0x16b   : > { %v607_v34 = vadd.f32 %v2044_v19, %v557_v33 }
 0x16c   : > { %v1469_v38 = vpop.f32.mrf.mxu0 }
 0x16d   : > { %v665_v39 = vmax.f32 %v607_v34, 0.0 }
 0x16e   : > { %v562_v29 = vpop.f32.mrf.mxu0 }
 0x16f   : > { %v692_v40 = vsel %vm638_vm7, %v665_v39, 0.0  ;;  %v608_v35 = vadd.f32 %v2044_v19, %v562_v29 }
 0x170   : > { %v1472_v41 = vpop.f32.mrf.mxu0  ;;  %v710_v45 = vrot.slane %v692_v40, 2  ;;  %v736_v47 = vrot.slane %v692_v40, 4 }
 0x171   : > { %v666_v44 = vmax.f32 %v608_v35, 0.0  ;;  %v1046_v41 = vrot.slane %v1883_v3, 3 }
 0x172   : > { %v567_v46 = vpop.f32.mrf.mxu0 }
 0x173   : > { %v711_v48 = vrot.slane %v666_v44, 2  ;;  %v737_v49 = vrot.slane %v666_v44, 4  ;;  %v609_v0 = vadd.f32 %v2044_v19, %v567_v46 }
 0x174   : > { %v1475_v43 = vpop.f32.mrf.mxu0 }
 0x175   : > { %v667_v50 = vmax.f32 %v609_v0, 0.0  ;;  %v712_v37 = vsel %vm393_vm2, %v710_v45, %v711_v48  ;;  %v738_v51 = vsel %vm735_vm8, %v736_v47, %v737_v49  ;;  %v1049_v43 = vrot.slane %v1880_v2, 3 }
 0x176   : > { %v572_v52 = vpop.f32.mrf.mxu0  ;;  %874 = vmatprep.mubr.f32.mxu1 %v712_v37  ;;  %1526 = vmatprep.mubr.f32.mxu0 %v738_v51 }
 0x177   : > { %v713_v53 = vrot.slane %v667_v50, 2  ;;  %v739_v54 = vrot.slane %v667_v50, 4  ;;  %v610_v55 = vadd.f32 %v2044_v19, %v572_v52  ;;  %1348 = vmatmul.mubr.msk.f32.vlgmr.msra.gmra.mxu1 %vm638_vm7, %v665_v39  ;;  %v1051_v52 = vrot.slane %v1895_v7, 3 }
 0x178   : > { %v1478_v56 = vpop.f32.mrf.mxu0 }
 0x179   : > { %v668_v57 = vmax.f32 %v610_v55, 0.0  ;;  %v714_v58 = vsel %vm393_vm2, %v711_v48, %v713_v53  ;;  %v740_v59 = vsel %vm735_vm8, %v737_v49, %v739_v54  ;;  %v1053_v55 = vrot.slane %v1905_v13, 3 }
 0x17a   : > { %v577_v60 = vpop.f32.mrf.mxu0  ;;  %879 = vmatprep.mubr.f32.mxu1 %v714_v58  ;;  %1527 = vmatmul.mubr.f32.vlgmr.msra.gmra.mxu0 %v740_v59  ;;  %v1052_v56 = vsel %vm1045_vm10, %v1049_v43, %v1051_v52  ;;  %v1057_v58 = vrot.slane %v1938_v30, 3 }
 0x17b   : > { %v715_v61 = vrot.slane %v668_v57, 2  ;;  %v741_v62 = vrot.slane %v668_v57, 4  ;;  %v611_v63 = vadd.f32 %v2044_v19, %v577_v60  ;;  %880 = vmatmul.mubr.f32.gmra.mxu1 %v666_v44  ;;  %1539 = vmatpush3.msk.msra.mxu0 %vm1079_vm6, %v1035_v27  ;;  %v1047_v44 = vrot.slane %v1877_v1, 3 }
 0x17c   : > { %v1481_v9 = vpop.f32.mrf.mxu0  ;;  %v1054_v7 = vsel %vm1045_vm10, %v1051_v52, %v1053_v55  ;;  %v1059_v60 = vrot.slane %v1950_v36, 3 }
 0x17d   : > { %v669_v10 = vmax.f32 %v611_v63, 0.0  ;;  %v716_v11 = vsel %vm393_vm2, %v713_v53, %v715_v61  ;;  %v742_v6 = vsel %vm735_vm8, %v739_v54, %v741_v62  ;;  %v1048_v51 = vsel %vm1045_vm10, %v1046_v41, %v1047_v44 }
 0x17e   : > { %v582_v12 = vpop.f32.mrf.mxu0  ;;  %884 = vmatprep.mubr.f32.mxu1 %v716_v11  ;;  %1529 = vmatprep.mubr.f32.mxu0 %v742_v6  ;;  %v1050_v2 = vsel %vm1045_vm10, %v1047_v44, %v1049_v43 }
 0x17f   : > { %v717_v14 = vrot.slane %v669_v10, 2  ;;  %v743_v15 = vrot.slane %v669_v10, 4  ;;  %v612_v16 = vadd.f32 %v2044_v19, %v582_v12  ;;  %885 = vmatmul.mubr.f32.gmra.mxu1 %v667_v50 }
 0x180   : > { %v1484_v4 = vpop.f32.mrf.mxu0 }
 0x181   : > { %v670_v18 = vmax.f32 %v612_v16, 0.0  ;;  %v718_v20 = vsel %vm393_vm2, %v715_v61, %v717_v14  ;;  %v744_v5 = vsel %vm735_vm8, %v741_v62, %v743_v15  ;;  %v1060_v61 = vsel %vm1045_vm10, %v1057_v58, %v1059_v60 }
 0x182   : > { %v587_v21 = vpop.f32.mrf.mxu0  ;;  %889 = vmatprep.mubr.f32.mxu1 %v718_v20  ;;  %1530 = vmatmul.mubr.f32.gmra.mxu0 %v744_v5 }
 0x183   : > { %v719_v22 = vrot.slane %v670_v18, 2  ;;  %v745_v23 = vrot.slane %v670_v18, 4  ;;  %v613_v25 = vadd.f32 %v2044_v19, %v587_v21  ;;  %890 = vmatmul.mubr.f32.gmra.mxu1 %v668_v57  ;;  %v1055_v57 = vrot.slane %v1926_v24, 3 }
 0x184   : > { %v1487_v26 = vpop.f32.mrf.mxu0  ;;  %v1061_v24 = vrot.slane %v1962_v42, 3 }
 0x185   : > { %v671_v27 = vmax.f32 %v613_v25, 0.0  ;;  %v720_v28 = vsel %vm393_vm2, %v717_v14, %v719_v22  ;;  %v746_v31 = vsel %vm735_vm8, %v743_v15, %v745_v23  ;;  %v1056_v59 = vsel %vm1045_vm10, %v1053_v55, %v1055_v57 }
 0x186   : > { %v592_v32 = vpop.f32.mrf.mxu0  ;;  %v597_v33 = vpop.f32.mrf.mxu1  ;;  %894 = vmatprep.mubr.f32.mxu1 %v720_v28  ;;  %1532 = vmatprep.mubr.f32.mxu0 %v746_v31  ;;  %v1058_v13 = vsel %vm1045_vm10, %v1055_v57, %v1057_v58  ;;  %v1062_v30 = vsel %vm1045_vm10, %v1059_v60, %v1061_v24 }
 0x187   : > { %v721_v34 = vrot.slane %v671_v27, 2  ;;  %v747_v38 = vrot.slane %v671_v27, 4  ;;  %v614_v39 = vadd.f32 %v2044_v19, %v592_v32  ;;  %v615_v29 = vadd.f32 %v2044_v19, %v597_v33  ;;  %895 = vmatmul.mubr.f32.gmra.mxu1 %v669_v10  ;;  %v1359_v33 = vld [vmem:[%s2180_s6] ss:$0 sm:$0xff] }
 0x188   : > { %v1490_v40 = vpop.f32.mrf.mxu0  ;;  %v1493_v35 = vpop.f32.mrf.mxu1 }
 0x189   : > { %v672_v45 = vmax.f32 %v614_v39, 0.0  ;;  %v673_v46 = vmax.f32 %v615_v29, 0.0  ;;  %v722_v47 = vsel %vm393_vm2, %v719_v22, %v721_v34  ;;  %v748_v48 = vsel %vm735_vm8, %v745_v23, %v747_v38 }
 0x18a   : > { %899 = vmatprep.mubr.f32.mxu1 %v722_v47  ;;  %1533 = vmatmul.mubr.f32.gmra.mxu0 %v748_v48 }
 0x18b   : > { %v723_v49 = vrot.slane %v672_v45, 2  ;;  %v749_v0 = vrot.slane %v672_v45, 4  ;;  %v700_v19 = vsel %vm655_vm9, %v673_v46, 0.0  ;;  %900 = vmatmul.mubr.f32.gmra.mxu1 %v670_v18 }
 0x18c   : > { %v725_v50 = vrot.slane %v700_v19, 2  ;;  %v751_v37 = vrot.slane %v700_v19, 4 }
 0x18d   : > { %v724_v3 = vsel %vm393_vm2, %v721_v34, %v723_v49  ;;  %v750_v1 = vsel %vm735_vm8, %v747_v38, %v749_v0  ;;  %v1349_v38 = vld [vmem:[%s2178_s4] ss:$0 sm:$0xff] }
 0x18e   : > { %904 = vmatprep.mubr.f32.mxu1 %v724_v3  ;;  %1535 = vmatprep.mubr.f32.mxu0 %v750_v1  ;;  %v752_v53 = vsel %vm735_vm8, %v749_v0, %v751_v37  ;;  %v726_v54 = vsel %vm393_vm2, %v723_v49, %v725_v50 }
 0x18f   : > { %905 = vmatmul.mubr.f32.gmra.mxu1 %v671_v27  ;;  %1536 = vmatmul.mubr.f32.gmra.mxu0 %v752_v53 }
 0x190   : > { %909 = vmatprep.mubr.f32.mxu1 %v726_v54  ;;  %1540 = vmatprep.mubr.msk.f32.mxu0 %vm438_vm3, %v1048_v51 }
 0x193   : > { %910 = vmatmul.mubr.f32.gmra.mxu1 %v672_v45  ;;  %1541 = vmatmul.mubr.msk.f32.vlgmr.msra.gmra.mxu0 %vm438_vm3, %v1050_v2 }
 0x194   : > { %1543 = vmatprep.mubr.msk.f32.mxu0 %vm438_vm3, %v1052_v56 }
 0x197   : > { %1544 = vmatmul.mubr.msk.f32.gmra.mxu0 %vm438_vm3, %v1054_v7 }
 0x198   : > { %1546 = vmatprep.mubr.msk.f32.mxu0 %vm438_vm3, %v1056_v59 }
 0x19b   : > { %1547 = vmatmul.mubr.msk.f32.gmra.mxu0 %vm438_vm3, %v1058_v13 }
 0x19c   : > { %1549 = vmatprep.mubr.msk.f32.mxu0 %vm438_vm3, %v1060_v61 }
 0x19f   : > { %1550 = vmatmul.mubr.msk.f32.gmra.mxu0 %vm438_vm3, %v1062_v30 }
 0x237   : > { %v1408_v62 = vpop.f32.mrf.mxu1 }
 0x239   : > { %v1409_v36 = vpop.f32.mrf.mxu1 }
 0x23a   : > { %v1528_v10 = vpop.f32.mrf.mxu0  ;;  %v1410_v23 = vadd.f32 %v1409_v36, %v1408_v62 }
 0x23b   : > { %v1411_v63 = vpop.f32.mrf.mxu1 }
 0x23c   : > { %v981_v12 = vpop.f32.mrf.mxu0 }
 0x23d   : > { %v1412_v9 = vpop.f32.mrf.mxu1  ;;  %v982_v34 = vadd.f32 %v1410_v23, %v981_v12 }
 0x23e   : > { %v1413_v5 = vadd.f32 %v1412_v9, %v1411_v63 }
 0x23f   : > { %v1414_v11 = vpop.f32.mrf.mxu1  ;;  %v1026_v48 = vadd.f32 %v1349_v38, %v982_v34 }
 0x240   : > { %v987_v27 = vadd.f32 %v1528_v10, %v1413_v5 }
 0x241   : > { %v1415_v6 = vpop.f32.mrf.mxu1 }
 0x242   : > { %v1531_v14 = vpop.f32.mrf.mxu0  ;;  %v1416_v28 = vadd.f32 %v1415_v6, %v1414_v11  ;;  %v1027_v41 = vadd.f32 %v1349_v38, %v987_v27 }
 0x243   : > { %v1417_v42 = vpop.f32.mrf.mxu1 }
 0x244   : > { %v991_v4 = vpop.f32.mrf.mxu0 }
 0x245   : > { %v1418_v15 = vpop.f32.mrf.mxu1  ;;  %v992_v45 = vadd.f32 %v1416_v28, %v991_v4 }
 0x246   : > { %v1419_v25 = vadd.f32 %v1418_v15, %v1417_v42 }
 0x247   : > { %v1420_v16 = vpop.f32.mrf.mxu1  ;;  %v1028_v52 = vadd.f32 %v1349_v38, %v992_v45 }
 0x248   : > { %v997_v39 = vadd.f32 %v1531_v14, %v1419_v25 }
 0x249   : > { %v1421_v17 = vpop.f32.mrf.mxu1 }
 0x24a   : > { %v1534_v18 = vpop.f32.mrf.mxu0  ;;  %v1422_v49 = vadd.f32 %v1421_v17, %v1420_v16  ;;  %v1029_v43 = vadd.f32 %v1349_v38, %v997_v39 }
 0x24b   : > { %v1423_v20 = vpop.f32.mrf.mxu1 }
 0x24c   : > { %v1001_v21 = vpop.f32.mrf.mxu0 }
 0x24d   : > { %v1424_v22 = vpop.f32.mrf.mxu1  ;;  %v1002_v54 = vadd.f32 %v1422_v49, %v1001_v21 }
 0x24e   : > { %v1425_v35 = vadd.f32 %v1424_v22, %v1423_v20 }
 0x24f   : > { %v1426_v26 = vpop.f32.mrf.mxu1  ;;  %v1537_v8 = vpop.f32.mrf.mxu0  ;;  %v1030_v24 = vadd.f32 %v1349_v38, %v1002_v54 }
 0x250   : > { %v1007_v37 = vadd.f32 %v1534_v18, %v1425_v35 }
 0x251   : > { %v1427_v31 = vpop.f32.mrf.mxu1  ;;  %v1011_v32 = vpop.f32.mrf.mxu0 }
 0x252   : > { %v1428_v2 = vadd.f32 %v1427_v31, %v1426_v26  ;;  %v1031_v59 = vadd.f32 %v1349_v38, %v1007_v37 }
 0x253   : > { %v1429_v29 = vpop.f32.mrf.mxu1  ;;  %v1542_v40 = vpop.f32.mrf.mxu0 }
 0x254   : > { %v1195_v44 = vadd.f32 %v1542_v40, %v1359_v33  ;;  %v1012_v61 = vadd.f32 %v1428_v2, %v1011_v32 }
 0x255   : > { %v1430_v46 = vpop.f32.mrf.mxu1  ;;  %v1149_v47 = vpop.f32.mrf.mxu0 }
 0x256   : > { %v1203_v0 = vadd.f32 %v1195_v44, %v1027_v41  ;;  %v1194_v19 = vadd.f32 %v1359_v33, %v1149_v47  ;;  %v1431_v3 = vadd.f32 %v1430_v46, %v1429_v29  ;;  %v1032_v6 = vadd.f32 %v1349_v38, %v1012_v61 }
 0x257   : > { %v1545_v50 = vpop.f32.mrf.mxu0 }
 0x258   : > { %1211 = vst [vmem:[%s2108_s17 + $0x8] sm:$0xff] %v1203_v0  ;;  %v1202_v1 = vadd.f32 %v1194_v19, %v1026_v48  ;;  %v1197_v51 = vadd.f32 %v1545_v50, %v1359_v33  ;;  %v1017_v7 = vadd.f32 %v1537_v8, %v1431_v3 }
 0x259   : > { %v1159_v53 = vpop.f32.mrf.mxu0 }
 0x25a   : > { %1210 = vst [vmem:[%s2108_s17] sm:$0xff] %v1202_v1  ;;  %v1205_v55 = vadd.f32 %v1197_v51, %v1029_v43  ;;  %v1196_v56 = vadd.f32 %v1359_v33, %v1159_v53  ;;  %v1033_v9 = vadd.f32 %v1349_v38, %v1017_v7 }
 0x25b   : > { %v1548_v57 = vpop.f32.mrf.mxu0 }
 0x25c   : > { %1213 = vst [vmem:[%s2108_s17 + $0x18] sm:$0xff] %v1205_v55  ;;  %v1204_v58 = vadd.f32 %v1196_v56, %v1028_v52  ;;  %v1199_v60 = vadd.f32 %v1548_v57, %v1359_v33 }
 0x25d   : > { %v1169_v13 = vpop.f32.mrf.mxu0 }
 0x25e   : > { %1212 = vst [vmem:[%s2108_s17 + $0x10] sm:$0xff] %v1204_v58  ;;  %v1207_v30 = vadd.f32 %v1199_v60, %v1031_v59  ;;  %v1198_v62 = vadd.f32 %v1359_v33, %v1169_v13 }
 0x25f   : > { %v1551_v36 = vpop.f32.mrf.mxu0 }
 0x260   : > { %1215 = vst [vmem:[%s2108_s17 + $0x28] sm:$0xff] %v1207_v30  ;;  %v1206_v63 = vadd.f32 %v1198_v62, %v1030_v24  ;;  %v1201_v10 = vadd.f32 %v1551_v36, %v1359_v33 }
 0x261   : > { %v1179_v11 = vpop.f32.mrf.mxu0 }
 0x262   : > { %1214 = vst [vmem:[%s2108_s17 + $0x20] sm:$0xff] %v1206_v63  ;;  %v1209_v12 = vadd.f32 %v1201_v10, %v1033_v9  ;;  %v1200_v42 = vadd.f32 %v1359_v33, %v1179_v11 }
 0x264   : > { %1217 = vst [vmem:[%s2108_s17 + $0x38] sm:$0xff] %v1209_v12  ;;  %v1208_v14 = vadd.f32 %v1200_v42, %v1032_v6 }
 0x266   : > { %1216 = vst [vmem:[%s2108_s17 + $0x30] sm:$0xff] %v1208_v14 }
 0x267   : > { %1668 = shalt.err (!%p1665_p3)
}
 0x268   : > { %s1669_s30 = scalar_lea.hbm %s2123_s22, 1024  ;;  %s1673_s17 = scalar_lea.hbm %s2181_s7, 2048 }
 0x269   : > { %p1670_p5 = scmp.ne.s32.totalorder %s2123_s22, %s1669_s30  ;;  %p1674_p9 = scmp.lt.s32.totalorder %s2123_s22, %s2181_s7 }
 0x26a   : > { %p1675_p12 = scmp.lt.s32.totalorder %s1673_s17, %s1669_s30 }
 0x26b   : > { %p1671_p6 = pnand %p1670_p5, %p1827_p4 }
 0x26c   : > { %p1676_p10 = por %p1675_p12, %p1674_p9 }
 0x26d   : > { %p1672_p7 = pneg %p1671_p6 }
 0x26f   : > { %p1677_p11 = pnand %p1676_p10, %p1672_p7 }
 0x271   : > { %1680 = shalt.err (!%p1677_p11)
}
 0x272   : > { %s1745_s21 = smov 128   ;;  %s1746_s23 = smov 8  }
 0x273   : > { %1559 = dma.vmem_to_hbm [thread:$0]  (%p1827_p4), %s2118_s18, 1024, %s2123_s22, %s2129_s27, %s1745_s21, %s1745_s21, %s1746_s23  }
 0x274 PF: > { %p1571_p13 = scmp.ge.s32.totalorder %s1735_s29, 2  ;;  %s1249_s8 = sand.u32 1, %s1715_s24  }
 0x275   : > { %s1250_s10 = scalar_lea.sflag [#allocation4], %s1249_s8 }
 0x276   : > { %p1566_p0 = pnand %p1571_p13, %p1834_p8 }
 0x278   : > { %p1567_p1 = pneg %p1566_p0 }
 0x27a   : > { %1710 = dma.done.wait (%p1567_p1), %s1250_s10, 1024  }
 0x27b   : > { %1712 = vsyncadd (%p1567_p1), %s1250_s10, 4294966272  ;;  %s21_s29 = sadd.s32 1, %s1735_s29   ;;  %s2186_s24 = smov %s1719_s25 }
 0x27c   : > { %p18_p2 = scmp.ge.s32.totalorder %s21_s29, 4   ;;  %s2187_s25 = smov %s1723_s26 }
 0x27d   : > { %s2188_s26 = smov %s1840_s14  ;;  %s2189_s27 = smov %s1731_s28 }
 0x27e   : > { %s2190_s28 = smov %s2192_s9  ;;  %20 = sbr.rel (!%p18_p2) target bundleno = 5 (0x5), region = 88 }
 0x283   :  { %1255 = vsyncpa [#allocation3], 1 }
 0x284   :  { %1257 = vsyncpa [#allocation3 + $0x1], 1 }
 0x285   :  { %1258 = vsyncpa [#allocation4], 1 }
 0x286   :  { %1260 = vsyncpa [#allocation4 + $0x1], 1 }

</bundles_post_ra>
